<compile_context>
chip_gen: v7x
topology: tpu7x:2x2x1
jax: 0.10.0
libtpu: 0.0.40
codegen_flags: <defaults>
</compile_context>

<pallas_src>
import jax
import jax.numpy as jnp
from jax.experimental import pallas as pl
from jax.experimental.pallas import tpu as pltpu


# ----------------------------- kernels ------------------------------------- #

def _identity_kernel(xm_ref, w_ref, b_ref, o_ref, acc_ref):
    # out = relu(x @ W_fc + b_fc) + x        (input_dim == output_dim)
    # Grid = (n_tiles, m_tiles, k_tiles), K innermost (reduction, f32 VMEM acc).
    # Wrapper guarantees tk == tn here (K == N), so the x K-tile with index
    # k == j is exactly the residual tile x[:, j*tn:(j+1)*tn]: no 2nd HBM read.
    j = pl.program_id(0)
    k = pl.program_id(2)
    nk = pl.num_programs(2)

    @pl.when(k == 0)
    def _():
        acc_ref[...] = jnp.zeros_like(acc_ref)

    acc_ref[...] += jnp.dot(xm_ref[...], w_ref[...],
                            preferred_element_type=jnp.float32)

    @pl.when(k == j)
    def _():
        # Stash the residual tile in the (k-resident) output block; read back
        # and combined at the final K step.
        o_ref[...] = xm_ref[...].astype(o_ref.dtype)

    @pl.when(k == nk - 1)
    def _():
        h = jnp.maximum(acc_ref[...] + b_ref[...], 0.0)
        o_ref[...] = (h + o_ref[...].astype(jnp.float32)).astype(o_ref.dtype)


def _identity_kernel_xres(xm_ref, xr_ref, w_ref, b_ref, o_ref, acc_ref):
    # Identity branch fallback when the residual tile is not a whole x K-tile
    # (tk != tn): residual arrives as its own (tm, tn) block.
    # TODO(synk): replace with a 128-aligned dynamic lane slice of the x block
    # once that path is validated on all target generations.
    k = pl.program_id(2)
    nk = pl.num_programs(2)

    @pl.when(k == 0)
    def _():
        acc_ref[...] = jnp.zeros_like(acc_ref)

    acc_ref[...] += jnp.dot(xm_ref[...], w_ref[...],
                            preferred_element_type=jnp.float32)

    @pl.when(k == nk - 1)
    def _():
        h = jnp.maximum(acc_ref[...] + b_ref[...], 0.0)
        o_ref[...] = (h + xr_ref[...].astype(jnp.float32)).astype(o_ref.dtype)


def _adjust_kernel(xm_ref, w_ref, b_ref, o_ref, acc_ref):
    # out = relu(x @ W_fc + b_fc) + (x @ W_adj + b_adj)
    # W_fc / W_adj are interleaved per N-tile into one (tk, 2*tn) RHS block, so
    # both matmuls share a single MXU pass over each x block.
    k = pl.program_id(2)
    nk = pl.num_programs(2)
    tn = o_ref.shape[-1]

    @pl.when(k == 0)
    def _():
        acc_ref[...] = jnp.zeros_like(acc_ref)

    acc_ref[...] += jnp.dot(xm_ref[...], w_ref[...],
                            preferred_element_type=jnp.float32)

    @pl.when(k == nk - 1)
    def _():
        h = acc_ref[...] + b_ref[...]
        o_ref[...] = (jnp.maximum(h[:, :tn], 0.0) + h[:, tn:]).astype(o_ref.dtype)


# ----------------------------- helpers -------------------------------------- #

def _round_up(a, b):
    return ((a + b - 1) // b) * b


def _pad2(a, rows, cols):
    r, c = a.shape
    if r == rows and c == cols:
        return a
    return jnp.pad(a, ((0, rows - r), (0, cols - c)))


def _divisors_desc(total, base, cap=None):
    # Divisors of `total` that are multiples of `base`, descending, <= cap.
    out = []
    for m in range(total // base, 0, -1):
        d = m * base
        if total % d == 0 and (cap is None or d <= cap):
            out.append(d)
    return out


def _tpu_vmem_bytes():
    try:
        return int(pltpu.get_tpu_info().vmem_capacity_bytes)
    except Exception:
        return 64 << 20          # conservative: v7x per-TensorCore VMEM


def _block_bytes(tm, tn, tk, w_cols, x_item, w_item, out_item):
    # Double-buffered input/output blocks + single f32 accumulator scratch.
    return (2 * tm * tk * x_item          # x block
            + 2 * tk * w_cols * w_item    # weight block
            + 2 * 8 * w_cols * 4          # bias block (sublane padded)
            + 2 * tm * tn * out_item      # output block
            + tm * w_cols * 4)            # f32 accumulator scratch


def _select_tiles(Kp, Np, w_factor, x_item, w_item, tm_max, tn_max, tk_max, budget):
    # Preference order: widest lane-dense tn, biggest tm, biggest tk that fits
    # the VMEM budget (shrink tk first, then tm, then tn).
    out_item = 4
    tn_cands = _divisors_desc(Np, 128, cap=tn_max)
    tk_cands = _divisors_desc(Kp, 128, cap=max(tk_max, 128) if tk_max else None)
    tm_cands = sorted({t for t in (tm_max, 256, 128, 64, 32, 16) if t <= tm_max},
                      reverse=True)
    for tn in tn_cands:
        for tm in tm_cands:
            for tk in tk_cands:
                if _block_bytes(tm, tn, tk, w_factor * tn,
                                x_item, w_item, out_item) <= budget:
                    return tm, tn, tk
    return 16, 128, 128          # last resort: smallest legal tiles


# ----------------------------- parameter packing ---------------------------- #

def pack_residual_params(w_fc, b_fc, w_adj=None, b_adj=None, *,
                         mxu_dtype="auto", tm_max=None, tn_max=None, tk_max=None):
    """Pad / cast / interleave ResidualLayer parameters once (reuse across calls).

    w_fc / w_adj: [K, N] (transposed PyTorch nn.Linear weight); b_*: [1, N].
    mxu_dtype: "auto" (bf16 for f32 params — recommended on v5e/v6e/v7x),
               None (keep param dtype), or an explicit dtype.  Accumulation,
               bias, ReLU and residual math are always f32; the f32 MXU path is
               still not bit-exact vs. a true fp32 PyTorch forward.
    """
    K, N = w_fc.shape
    assert b_fc.shape == (1, N)
    identity = (K == N)
    if not identity:
        assert w_adj is not None and b_adj is not None
        assert w_adj.shape == (K, N) and b_adj.shape == (1, N)

    if mxu_dtype == "auto":
        w_dtype = jnp.bfloat16 if jnp.dtype(w_fc.dtype) == jnp.float32 \
            else jnp.dtype(w_fc.dtype)
    elif mxu_dtype is None:
        w_dtype = jnp.dtype(w_fc.dtype)
    else:
        w_dtype = jnp.dtype(mxu_dtype)

    vmem_cap = _tpu_vmem_bytes()
    # Generation-aware tile caps (bigger on 128 MiB VMEM parts like v5e/v6e).
    if tm_max is None:
        tm_max = 512 if vmem_cap >= (100 << 20) else 256
    if tn_max is None:
        tn_max = 1024 if vmem_cap >= (100 << 20) else 512
    tm_max = max(16, (int(tm_max) // 16) * 16)
    tn_max = max(int(tn_max), 128)          # lane width floor is 128
    budget = max(vmem_cap - (16 << 20), 24 << 20)

    Kp = _round_up(K, 128)
    Np = _round_up(N, 128)
    w_item = jnp.dtype(w_dtype).itemsize
    x_item = w_item                          # x is cast to the MXU dtype
    w_factor = 1 if identity else 2
    tm, tn, tk = _select_tiles(Kp, Np, w_factor, x_item, w_item,
                               tm_max, tn_max, tk_max, budget)
    nb_n = Np // tn

    wf = _pad2(w_fc, Kp, Np).astype(w_dtype)
    bf = _pad2(b_fc, 1, Np).astype(jnp.float32)
    if identity:
        w_packed, b_packed, w_cols = wf, bf, tn
    else:
        wa = _pad2(w_adj, Kp, Np).astype(w_dtype)
        ba = _pad2(b_adj, 1, Np).astype(jnp.float32)
        # Interleave per N-tile: [.. | Wfc tile j | Wadj tile j | ..] so one
        # (tk, 2*tn) block feeds a single fused MXU pass per grid point.
        w_packed = jnp.concatenate(
            [wf.reshape(Kp, nb_n, 1, tn), wa.reshape(Kp, nb_n, 1, tn)],
            axis=2).reshape(Kp, nb_n * 2 * tn)
        b_packed = jnp.concatenate(
            [bf.reshape(1, nb_n, 1, tn), ba.reshape(1, nb_n, 1, tn)],
            axis=2).reshape(1, nb_n * 2 * tn)
        w_cols = 2 * tn

    return dict(identity=identity, K=K, N=N, Kp=Kp, Np=Np,
                tm=tm, tn=tn, tk=tk, w_cols=w_cols,
                w=w_packed, b=b_packed, w_dtype=w_dtype, vmem_cap=vmem_cap)


# ----------------------------- forward (Pallas) ----------------------------- #

def residual_layer_apply(x, params):
    """ResidualLayer forward with pre-packed parameters (see pack_residual_params)."""
    M, K = x.shape
    assert K == params["K"]
    identity = params["identity"]
    Kp, Np = params["Kp"], params["Np"]
    tn, tk, w_cols = params["tn"], params["tk"], params["w_cols"]
    w_dtype = params["w_dtype"]

    tm = min(params["tm"], _round_up(M, 16))
    Mp = _round_up(M, tm)
    nb_n, nb_m, nb_k = Np // tn, Mp // tm, Kp // tk

    # Pad AND cast x once here (not per tile in the kernel): halves x HBM/VMEM
    # traffic for bf16 and avoids nb_n redundant VPU casts of the same data.
    x_p = _pad2(x, Mp, Kp).astype(w_dtype)

    x_spec = pl.BlockSpec((tm, tk), lambda j, i, k: (i, k))
    w_spec = pl.BlockSpec((tk, w_cols), lambda j, i, k: (k, j))
    b_spec = pl.BlockSpec((1, w_cols), lambda j, i, k: (0, j))
    out_spec = pl.BlockSpec((tm, tn), lambda j, i, k: (i, j))
    out_shape = jax.ShapeDtypeStruct((Mp, Np), x.dtype)
    scratch = [pltpu.VMEM((tm, w_cols), jnp.float32)]
    # TODO(synk): when nb_k == 1 and nb_m >= 2, pipeline_mode=pl.Buffered(1) on
    # w_spec/b_spec would drop the largest double-buffer (weights change only on
    # the outer N axis) — useful extra headroom on v7x's 64 MiB VMEM.

    if identity and tk == tn:
        kernel, in_specs, operands = _identity_kernel, [x_spec, w_spec, b_spec], \
            (x_p, params["w"], params["b"])
    elif identity:
        xr_spec = pl.BlockSpec((tm, tn), lambda j, i, k: (i, j))
        kernel, in_specs, operands = _identity_kernel_xres, \
            [x_spec, xr_spec, w_spec, b_spec], (x_p, x_p, params["w"], params["b"])
    else:
        kernel, in_specs, operands = _adjust_kernel, [x_spec, w_spec, b_spec], \
            (x_p, params["w"], params["b"])

    # Megacore: prefer splitting the outer N axis (each TensorCore then owns
    # disjoint weight tiles -> weight HBM traffic stays 1x). K (reduction with
    # a resident accumulator) is always "arbitrary".
    if nb_n >= 2:
        dims = ("parallel", "arbitrary", "arbitrary")
    else:
        dims = ("arbitrary", "parallel", "arbitrary")

    w_item = jnp.dtype(w_dtype).itemsize
    block_bytes = _block_bytes(tm, tn, tk, w_cols, w_item, w_item,
                               x.dtype.itemsize)
    # Clamp the scoped-VMEM request to the device's physical VMEM (64 MiB v7x,
    # 128 MiB v5e/v6e) with headroom for compiler-internal scratch.
    vmem_limit = min(params["vmem_cap"],
                     max(block_bytes + (16 << 20), 32 << 20))

    mul = 2 if identity else 4
    flops = mul * Mp * Kp * Np + 2 * Mp * Np
    bytes_accessed = (nb_n * x_p.size * x_p.dtype.itemsize
                      + (nb_m if nb_k > 1 else 1) * params["w"].size * w_item
                      + params["b"].size * 4
                      + Mp * Np * x.dtype.itemsize)

    out = pl.pallas_call(
        kernel,
        out_shape=out_shape,
        grid_spec=pltpu.PrefetchScalarGridSpec(
            num_scalar_prefetch=0,
            grid=(nb_n, nb_m, nb_k),
            in_specs=in_specs,
            out_specs=out_spec,
            scratch_shapes=scratch),
        compiler_params=pltpu.CompilerParams(
            dimension_semantics=dims,
            vmem_limit_bytes=int(vmem_limit)),
        cost_estimate=pl.CostEstimate(
            flops=int(flops), transcendentals=0,
            bytes_accessed=int(bytes_accessed)),
    )(*operands)

    return out[:M, :params["N"]]


def residual_layer(x, w_fc, b_fc, w_adj=None, b_adj=None, *,
                   mxu_dtype="auto", tm_max=None, tn_max=None, tk_max=None,
                   min_pallas_elems=1 << 16):
    """Convenience entry point: pack parameters and run the Pallas forward.

    For repeated forwards with the same weights, call pack_residual_params once
    and residual_layer_apply per call instead (avoids re-padding / re-interleaving
    the weights every call).
    """
    M, K = x.shape
    _, N = w_fc.shape
    identity = (K == N)

    # Tiny problems: pallas_call launch/step overhead dominates -> let XLA fuse.
    if M * K * N < min_pallas_elems:
        out = jnp.maximum(x @ w_fc + b_fc, 0.0)
        if identity:
            return out + x
        return out + (x @ w_adj + b_adj)

    params = pack_residual_params(w_fc, b_fc, w_adj, b_adj, mxu_dtype=mxu_dtype,
                                  tm_max=tm_max, tn_max=tn_max, tk_max=tk_max)
    return residual_layer_apply(x, params)


# ----------------------------- test harness --------------------------------- #

def _init_linear(key, in_dim, out_dim):
    # nn.Linear default init: U(-1/sqrt(in_dim), 1/sqrt(in_dim)).
    kw, kb = jax.random.split(key)
    bound = 1.0 / (in_dim ** 0.5)
    w = jax.random.uniform(kw, (in_dim, out_dim), jnp.float32, -bound, bound)
    b = jax.random.uniform(kb, (1, out_dim), jnp.float32, -bound, bound)
    return w, b


def _reference(x, w_fc, b_fc, w_adj=None, b_adj=None, precision=None):
    out = jax.nn.relu(jnp.dot(x, w_fc, precision=precision) + b_fc)
    if x.shape[1] == w_fc.shape[1]:
        return out + x
    return out + (jnp.dot(x, w_adj, precision=precision) + b_adj)


if __name__ == "__main__":
    key = jax.random.PRNGKey(0)
    keys = jax.random.split(key, 16)
    hp = jax.lax.Precision.HIGHEST

    # 1) Tiny adjust-branch shapes -> XLA fallback path (below threshold).
    x = jax.random.normal(keys[0], (8, 32), jnp.float32)
    w_fc, b_fc = _init_linear(keys[1], 32, 64)
    w_adj, b_adj = _init_linear(keys[2], 32, 64)
    out = jax.block_until_ready(residual_layer(x, w_fc, b_fc, w_adj, b_adj))
    ref = _reference(x, w_fc, b_fc, w_adj, b_adj)
    assert jnp.allclose(out, ref, atol=1e-5, rtol=1e-5)

    # 2) Adjust branch through Pallas (default bf16 MXU operands).
    M, K, N = 200, 96, 160
    x = jax.random.normal(keys[3], (M, K), jnp.float32)
    w_fc, b_fc = _init_linear(keys[4], K, N)
    w_adj, b_adj = _init_linear(keys[5], K, N)
    ref = _reference(x, w_fc, b_fc, w_adj, b_adj, precision=hp)
    out = jax.block_until_ready(residual_layer(x, w_fc, b_fc, w_adj, b_adj))
    assert out.shape == ref.shape
    assert jnp.allclose(out, ref, atol=5e-2, rtol=5e-2)

    # 2b) Same shapes, f32 MXU operands (tighter tolerance).
    out32 = jax.block_until_ready(
        residual_layer(x, w_fc, b_fc, w_adj, b_adj, mxu_dtype=jnp.float32))
    assert jnp.allclose(out32, ref, atol=2e-2, rtol=2e-2)

    # 2c) Pack once / apply many (params reused across calls and batch sizes).
    params = pack_residual_params(w_fc, b_fc, w_adj, b_adj)
    out_a = jax.block_until_ready(residual_layer_apply(x, params))
    out_b = jax.block_until_ready(residual_layer_apply(x[:64], params))
    assert jnp.allclose(out_a, ref, atol=5e-2, rtol=5e-2)
    assert jnp.allclose(out_b, ref[:64], atol=5e-2, rtol=5e-2)

    # 3) Identity branch, fused in-VMEM residual (single N tile).
    M2, D = 160, 192
    x2 = jax.random.normal(keys[6], (M2, D), jnp.float32)
    w_fc2, b_fc2 = _init_linear(keys[7], D, D)
    w_adj2, b_adj2 = _init_linear(keys[8], D, D)   # present but unused (identity)
    ref2 = _reference(x2, w_fc2, b_fc2, w_adj2, b_adj2, precision=hp)
    out2 = jax.block_until_ready(residual_layer(x2, w_fc2, b_fc2, w_adj2, b_adj2))
    assert jnp.allclose(out2, ref2, atol=5e-2, rtol=5e-2)

    # 4) Identity branch, multi-tile N/M + K-blocked accumulator (tk == tn),
    #    fused in-VMEM residual with k_res == j > 0.
    M3, D3 = 272, 256
    x3 = jax.random.normal(keys[9], (M3, D3), jnp.float32)
    w_fc3, b_fc3 = _init_linear(keys[10], D3, D3)
    ref3 = _reference(x3, w_fc3, b_fc3, precision=hp)
    out3 = jax.block_until_ready(residual_layer(
        x3, w_fc3, b_fc3, tm_max=128, tn_max=128, tk_max=128))
    assert jnp.allclose(out3, ref3, atol=5e-2, rtol=5e-2)

    # 5) Identity branch, multi-tile N with full-K blocks (tk != tn) -> explicit
    #    residual-input fallback kernel.
    out3b = jax.block_until_ready(residual_layer(x3, w_fc3, b_fc3, tn_max=128))
    assert jnp.allclose(out3b, ref3, atol=5e-2, rtol=5e-2)

    # 6) Adjust branch, multi-tile N/M + K-blocked accumulator.
    M4, K4, N4 = 272, 256, 384
    x4 = jax.random.normal(keys[11], (M4, K4), jnp.float32)
    w_fc4, b_fc4 = _init_linear(keys[12], K4, N4)
    w_adj4, b_adj4 = _init_linear(keys[13], K4, N4)
    ref4 = _reference(x4, w_fc4, b_fc4, w_adj4, b_adj4, precision=hp)
    out4 = jax.block_until_ready(residual_layer(
        x4, w_fc4, b_fc4, w_adj4, b_adj4, tm_max=128, tn_max=128, tk_max=128))
    assert jnp.allclose(out4, ref4, atol=5e-2, rtol=5e-2)

    print("KERNEL_OK")
</pallas_src>

<mosaic_0001>
module attributes {stable_mosaic.version = 11 : i64} {
  func.func @_adjust_kernel(%arg0: i32, %arg1: i32, %arg2: i32, %arg3: memref<208x128xbf16, #tpu.memory_space<vmem>>, %arg4: memref<128x512xbf16, #tpu.memory_space<vmem>>, %arg5: memref<1x512xf32, #tpu.memory_space<vmem>>, %arg6: memref<208x256xf32, #tpu.memory_space<vmem>>, %arg7: memref<208x512xf32, #tpu.memory_space<vmem>>) attributes {dimension_semantics = [#tpu.dimension_semantics<arbitrary>, #tpu.dimension_semantics<parallel>, #tpu.dimension_semantics<arbitrary>], iteration_bounds = array<i64: 1, 1, 1>, scalar_prefetch = 0 : i64, scratch_operands = 1 : i64, tpu.core_type = #tpu.core_type<tc>, window_params = [{transform_indices = @transform_0, window_bounds = array<i64: 208, 128>}, {transform_indices = @transform_1, window_bounds = array<i64: 128, 512>}, {transform_indices = @transform_2, window_bounds = array<i64: 1, 512>}, {transform_indices = @transform_3, window_bounds = array<i64: 208, 256>}]} {
    %c0_i32 = arith.constant 0 : i32
    %0 = arith.cmpi eq, %arg2, %c0_i32 : i32
    %1 = arith.extui %0 : i1 to i32
    %c0_i32_0 = arith.constant 0 : i32
    %2 = arith.cmpi ne, %1, %c0_i32_0 : i32
    scf.if %2 {
      %cst_10 = arith.constant 0.000000e+00 : f32
      %12 = vector.broadcast %cst_10 : f32 to vector<208x512xf32>
      %c0_11 = arith.constant 0 : index
      %c0_12 = arith.constant 0 : index
      %13 = vector.load %arg7[%c0_11, %c0_12] : memref<208x512xf32, #tpu.memory_space<vmem>>, vector<208x512xf32>
      tpu.vector_store %arg7[%c0_11, %c0_12], %12 {strides = array<i32>} : memref<208x512xf32, #tpu.memory_space<vmem>>, vector<208x512xf32>,
    } else {
    }
    %c0 = arith.constant 0 : index
    %c0_1 = arith.constant 0 : index
    %3 = vector.load %arg7[%c0, %c0_1] : memref<208x512xf32, #tpu.memory_space<vmem>>, vector<208x512xf32>
    %c0_2 = arith.constant 0 : index
    %c0_3 = arith.constant 0 : index
    %4 = vector.load %arg3[%c0_2, %c0_3] : memref<208x128xbf16, #tpu.memory_space<vmem>>, vector<208x128xbf16>
    %c0_4 = arith.constant 0 : index
    %c0_5 = arith.constant 0 : index
    %5 = vector.load %arg4[%c0_4, %c0_5] : memref<128x512xbf16, #tpu.memory_space<vmem>>, vector<128x512xbf16>
    %cst = arith.constant dense<0.000000e+00> : vector<208x512xf32>
    %6 = tpu.matmul %4, %5, %cst {dimension_numbers = #tpu.dot_dimension_numbers<[1], [0], [0], [1], [0, 0, 1, 1], [], []>} : vector<208x128xbf16>, vector<128x512xbf16>, vector<208x512xf32> -> vector<208x512xf32>
    %7 = arith.addf %3, %6 : vector<208x512xf32>
    %c0_6 = arith.constant 0 : index
    %c0_7 = arith.constant 0 : index
    %8 = vector.load %arg7[%c0_6, %c0_7] : memref<208x512xf32, #tpu.memory_space<vmem>>, vector<208x512xf32>
    tpu.vector_store %arg7[%c0_6, %c0_7], %7 {strides = array<i32>} : memref<208x512xf32, #tpu.memory_space<vmem>>, vector<208x512xf32>,
    %c0_i32_8 = arith.constant 0 : i32
    %9 = arith.cmpi eq, %arg2, %c0_i32_8 : i32
    %10 = arith.extui %9 : i1 to i32
    %c0_i32_9 = arith.constant 0 : i32
    %11 = arith.cmpi ne, %10, %c0_i32_9 : i32
    scf.if %11 {
      %c0_10 = arith.constant 0 : index
      %c0_11 = arith.constant 0 : index
      %12 = vector.load %arg7[%c0_10, %c0_11] : memref<208x512xf32, #tpu.memory_space<vmem>>, vector<208x512xf32>
      %c0_12 = arith.constant 0 : index
      %c0_13 = arith.constant 0 : index
      %13 = vector.load %arg5[%c0_12, %c0_13] : memref<1x512xf32, #tpu.memory_space<vmem>>, vector<1x512xf32>
      %14 = vector.broadcast %13 : vector<1x512xf32> to vector<208x512xf32>
      %15 = arith.addf %12, %14 : vector<208x512xf32>
      %16 = vector.extract_strided_slice %15 {offsets = [0, 0], sizes = [208, 256], strides = [1, 1]} : vector<208x512xf32> to vector<208x256xf32>
      %cst_14 = arith.constant 0.000000e+00 : f32
      %17 = vector.broadcast %cst_14 : f32 to vector<208x256xf32>
      %18 = arith.maximumf %16, %17 : vector<208x256xf32>
      %19 = vector.extract_strided_slice %15 {offsets = [0, 256], sizes = [208, 256], strides = [1, 1]} : vector<208x512xf32> to vector<208x256xf32>
      %20 = arith.addf %18, %19 : vector<208x256xf32>
      %c0_15 = arith.constant 0 : index
      %c0_16 = arith.constant 0 : index
      %21 = vector.load %arg6[%c0_15, %c0_16] : memref<208x256xf32, #tpu.memory_space<vmem>>, vector<208x256xf32>
      tpu.vector_store %arg6[%c0_15, %c0_16], %20 {strides = array<i32>} : memref<208x256xf32, #tpu.memory_space<vmem>>, vector<208x256xf32>,
    } else {
    }
    return
  }
  func.func @transform_0(%arg0: i32, %arg1: i32, %arg2: i32) -> (i32, i32) {
    %c0_i32 = arith.constant 0 : i32
    return %arg1, %arg2 : i32, i32
  }
  func.func @transform_1(%arg0: i32, %arg1: i32, %arg2: i32) -> (i32, i32) {
    %c0_i32 = arith.constant 0 : i32
    return %arg2, %arg0 : i32, i32
  }
  func.func @transform_2(%arg0: i32, %arg1: i32, %arg2: i32) -> (i32, i32) {
    %c0_i32 = arith.constant 0 : i32
    %c0_i32_0 = arith.constant 0 : i32
    return %c0_i32, %arg0 : i32, i32
  }
  func.func @transform_3(%arg0: i32, %arg1: i32, %arg2: i32) -> (i32, i32) {
    %c0_i32 = arith.constant 0 : i32
    return %arg1, %arg0 : i32, i32
  }
}

</mosaic_0001>

<bundles_post_ra>
// kernel: tpu_custom_call.1
= control target key start
LH: loop header
LB: loop body
LE: loop exit
PB: predicated region body
PF: predicated region fallthrough
CT: control target
= control target key end

     0   :  { %8 = vsyncpa [#allocation4], 0  ;;  %s1890_s0 = inlined_call_operand.hbm [shape: bf16[208,128], index: 0, kind: input, shape index: {}]   ;;  %s1891_s1 = inlined_call_operand.hbm [shape: bf16[128,512], index: 1, kind: input, shape index: {}]   ;;  %s1892_s2 = inlined_call_operand.vmem [shape: f32[1,512], index: 2, kind: input, shape index: {}]   ;;  %s1893_s3 = inlined_call_operand.hbm [shape: f32[208,256], index: 3, kind: output, shape index: {}]  }
   0x1   :  { %9 = vsyncpa [#allocation7], 0 }
   0x2   :  { %10 = vsyncpa [#allocation5], 0  ;;  %s1679_s12 = smov [#allocation3]   ;;  %s1607_s16 = scalar_lea.hbm %s1890_s0, 1664 }
   0x3   :  { %s16_s13 = sshll.u32 %s1679_s12, 4  ;;  %p1608_p0 = scmp.ne.s32.totalorder %s1890_s0, %s1607_s16  ;;  %s17_s13 = int_to_ptr.vmem [resolvable:$true] %s16_s13 }
   0x4   :  { %p1611_p1 = scmp.lt.u32.totalorder %s1607_s16, %s1890_s0 }
   0x6   :  { %p1613_p2 = pnand %p1611_p1, %p1608_p0 }
   0x8   :  { %1616 = shalt.err (!%p1613_p2)
}
   0x9   :  { %s1617_s21 = scalar_lea.vmem %s17_s13, 1664  ;;  %p1622_p4 = scmp.lt.s32.totalorder %s17_s13, %s17_s13 }
   0xa   :  { %p1618_p3 = scmp.ne.s32.totalorder %s17_s13, %s1617_s21  ;;  %p1623_p5 = scmp.lt.s32.totalorder %s1617_s21, %s1617_s21 }
   0xc   :  { %p1624_p6 = por %p1623_p5, %p1622_p4 }
   0xe   :  { %p1625_p7 = pnand %p1624_p6, %p1618_p3 }
  0x10   :  { %1628 = shalt.err (!%p1625_p7)
}
  0x11   :  { %s1680_s22 = smov 64   ;;  %s1681_s23 = smov 4  }
  0x12   :  { %22 = dma.hbm_to_vmem [thread:$0]  %s1890_s0, 1664, %s17_s13, [#allocation4], %s1680_s22, %s1680_s22, %s1681_s23  }
  0x13   :  { %s1682_s26 = smov [#allocation6]   ;;  %s1629_s30 = scalar_lea.hbm %s1891_s1, 4096 }
  0x14   :  { %s28_s27 = sshll.u32 %s1682_s26, 4  ;;  %p1630_p8 = scmp.ne.s32.totalorder %s1891_s1, %s1629_s30  ;;  %s29_s27 = int_to_ptr.vmem [resolvable:$true] %s28_s27 }
  0x15   :  { %p1633_p9 = scmp.lt.u32.totalorder %s1629_s30, %s1891_s1 }
  0x17   :  { %p1635_p10 = pnand %p1633_p9, %p1630_p8 }
  0x19   :  { %1638 = shalt.err (!%p1635_p10)
}
  0x1a   :  { %s1639_s8 = scalar_lea.vmem %s29_s27, 4096  ;;  %p1644_p12 = scmp.lt.s32.totalorder %s29_s27, %s29_s27 }
  0x1b   :  { %p1640_p11 = scmp.ne.s32.totalorder %s29_s27, %s1639_s8  ;;  %p1645_p13 = scmp.lt.s32.totalorder %s1639_s8, %s1639_s8 }
  0x1d   :  { %p1646_p0 = por %p1645_p13, %p1644_p12 }
  0x1f   :  { %p1647_p1 = pnand %p1646_p0, %p1640_p11 }
  0x21   :  { %1650 = shalt.err (!%p1647_p1)
}
  0x22   :  { %s1683_s0 = smov 256   ;;  %s1684_s9 = smov 16  }
  0x23   :  { %34 = dma.hbm_to_vmem [thread:$0]  %s1891_s1, 4096, %s29_s27, [#allocation7], %s1683_s0, %s1683_s0, %s1684_s9  }
  0x24   :  { %1673 = dma.done.wait [#allocation4], 1664  }
  0x25   :  { %1674 = vsyncadd [#allocation4], 4294965632 }
  0x26   :  { %1675 = dma.done.wait [#allocation7], 4096  }
  0x27   :  { %1676 = vsyncadd [#allocation7], 4294963200  ;;  %v1685_v0 = vmov 0   ;;  %v1546_v1 = vld [vmem:[#allocation6 + $0x4] ss:$16 sps:$4 sm:$0xff]   ;;  %v1594_v33 = vld [vmem:[#allocation3] sm:$0xff]   ;;  %v1195_v46 = vlaneseq }
  0x28   :  { %584 = vmatprep.mubr.bf16.mxu0 %v1685_v0  ;;  %747 = vmatprep.mubr.bf16.mxu1 %v1685_v0  ;;  %v1548_v2 = vld [vmem:[#allocation6 + $0xc] ss:$16 sps:$4 sm:$0xff]   ;;  %v1550_v3 = vld [vmem:[#allocation6] ss:$16 sps:$4 sm:$0xff]   ;;  %v1551_v4 = vld [vmem:[#allocation6 + $0x8] ss:$16 sps:$4 sm:$0xff]  }
  0x29   :  { %552 = vmatprep.subr.bf16.mxu0 %v1546_v1  ;;  %715 = vmatprep.subr.bf16.mxu1 %v1548_v2  ;;  %v1552_v5 = vld [vmem:[#allocation6 + $0x24] ss:$16 sps:$4 sm:$0xff]   ;;  %v1554_v6 = vld [vmem:[#allocation6 + $0x2c] ss:$16 sps:$4 sm:$0xff]   ;;  %v1556_v7 = vld [vmem:[#allocation6 + $0x20] ss:$16 sps:$4 sm:$0xff]  }
  0x2a   :  { %553 = vmatpush1.bf16.msra.mxu0 %v1550_v3  ;;  %716 = vmatpush1.bf16.msra.mxu1 %v1551_v4  ;;  %v1557_v8 = vld [vmem:[#allocation6 + $0x28] ss:$16 sps:$4 sm:$0xff]   ;;  %v1558_v9 = vld [vmem:[#allocation6 + $0x44] ss:$16 sps:$4 sm:$0xff]   ;;  %v1560_v10 = vld [vmem:[#allocation6 + $0x4c] ss:$16 sps:$4 sm:$0xff]  }
  0x2b   :  { %554 = vmatprep.subr.bf16.mxu0 %v1552_v5  ;;  %717 = vmatprep.subr.bf16.mxu1 %v1554_v6  ;;  %v1562_v11 = vld [vmem:[#allocation6 + $0x40] ss:$16 sps:$4 sm:$0xff]   ;;  %v1563_v12 = vld [vmem:[#allocation6 + $0x48] ss:$16 sps:$4 sm:$0xff]   ;;  %v1564_v13 = vld [vmem:[#allocation6 + $0x64] ss:$16 sps:$4 sm:$0xff]  }
  0x2c   :  { %v1566_v14 = vld [vmem:[#allocation6 + $0x6c] ss:$16 sps:$4 sm:$0xff]   ;;  %v1568_v15 = vld [vmem:[#allocation6 + $0x60] ss:$16 sps:$4 sm:$0xff]   ;;  %v1569_v16 = vld [vmem:[#allocation6 + $0x68] ss:$16 sps:$4 sm:$0xff]  }
  0x2d   :  { %v1570_v17 = vld [vmem:[#allocation6 + $0x84] ss:$16 sps:$4 sm:$0xff]   ;;  %v1572_v18 = vld [vmem:[#allocation6 + $0x8c] ss:$16 sps:$4 sm:$0xff]   ;;  %v1574_v19 = vld [vmem:[#allocation6 + $0x80] ss:$16 sps:$4 sm:$0xff]  }
  0x2e   :  { %555 = vmatpush1.bf16.msra.mxu0 %v1556_v7  ;;  %718 = vmatpush1.bf16.msra.mxu1 %v1557_v8  ;;  %v1575_v20 = vld [vmem:[#allocation6 + $0x88] ss:$16 sps:$4 sm:$0xff]   ;;  %v1576_v21 = vld [vmem:[#allocation6 + $0xa4] ss:$16 sps:$4 sm:$0xff]   ;;  %v1578_v22 = vld [vmem:[#allocation6 + $0xac] ss:$16 sps:$4 sm:$0xff]  }
  0x2f   :  { %556 = vmatprep.subr.bf16.mxu0 %v1558_v9  ;;  %719 = vmatprep.subr.bf16.mxu1 %v1560_v10  ;;  %v1580_v23 = vld [vmem:[#allocation6 + $0xa0] ss:$16 sps:$4 sm:$0xff]   ;;  %v1581_v24 = vld [vmem:[#allocation6 + $0xa8] ss:$16 sps:$4 sm:$0xff]   ;;  %v1582_v25 = vld [vmem:[#allocation6 + $0xc4] ss:$16 sps:$4 sm:$0xff]  }
  0x30   :  { %v1584_v26 = vld [vmem:[#allocation6 + $0xcc] ss:$16 sps:$4 sm:$0xff]   ;;  %v1586_v27 = vld [vmem:[#allocation6 + $0xc0] ss:$16 sps:$4 sm:$0xff]   ;;  %v1587_v28 = vld [vmem:[#allocation6 + $0xc8] ss:$16 sps:$4 sm:$0xff]  }
  0x31   :  { %v1588_v29 = vld [vmem:[#allocation6 + $0xe4] ss:$16 sps:$4 sm:$0xff]   ;;  %v1590_v30 = vld [vmem:[#allocation6 + $0xec] ss:$16 sps:$4 sm:$0xff]   ;;  %v1592_v31 = vld [vmem:[#allocation6 + $0xe0] ss:$16 sps:$4 sm:$0xff]  }
  0x32   :  { %557 = vmatpush1.bf16.msra.mxu0 %v1562_v11  ;;  %720 = vmatpush1.bf16.msra.mxu1 %v1563_v12  ;;  %v1593_v32 = vld [vmem:[#allocation6 + $0xe8] ss:$16 sps:$4 sm:$0xff]   ;;  %v1595_v34 = vld [vmem:[#allocation3 + $0x8] sm:$0xff]   ;;  %v1597_v36 = vld [vmem:[#allocation3 + $0x18] sm:$0xff]   ;;  %v1196_v47 = vshrl.u32 %v1195_v46, 7 }
  0x33   :  { %558 = vmatprep.subr.bf16.mxu0 %v1564_v13  ;;  %721 = vmatprep.subr.bf16.mxu1 %v1566_v14  ;;  %v1596_v35 = vld [vmem:[#allocation3 + $0x10] sm:$0xff]   ;;  %v1598_v37 = vld [vmem:[#allocation3 + $0x20] sm:$0xff]   ;;  %v1599_v38 = vld [vmem:[#allocation3 + $0x28] sm:$0xff]  }
  0x34   :  { %v1600_v39 = vld [vmem:[#allocation3 + $0x30] sm:$0xff]   ;;  %v1601_v40 = vld [vmem:[#allocation3 + $0x38] sm:$0xff]   ;;  %v1602_v41 = vld [vmem:[#allocation3 + $0x40] sm:$0xff]   ;;  %v1197_v48 = vsub.s32 0, %v1196_v47  ;;  %v1205_v49 = vsub.s32 2, %v1196_v47  ;;  %v1201_v51 = vsub.s32 1, %v1196_v47 }
  0x35   :  { %v1603_v42 = vld [vmem:[#allocation3 + $0x48] sm:$0xff]   ;;  %v1604_v43 = vld [vmem:[#allocation3 + $0x50] sm:$0xff]   ;;  %v1605_v44 = vld [vmem:[#allocation3 + $0x58] sm:$0xff]   ;;  %v1209_v52 = vsub.s32 3, %v1196_v47 }
  0x36   :  { %559 = vmatpush1.bf16.msra.mxu0 %v1568_v15  ;;  %722 = vmatpush1.bf16.msra.mxu1 %v1569_v16  ;;  %v1606_v45 = vld [vmem:[#allocation3 + $0x60] sm:$0xff]  }
  0x37   :  { %560 = vmatprep.subr.bf16.mxu0 %v1570_v17  ;;  %723 = vmatprep.subr.bf16.mxu1 %v1572_v18  ;;  %v1193_v50 = vld [vmem:[%s1892_s2] sm:$0xf]  ;;  %s1686_s2 = smov [#allocation8]  }
  0x38   :  { %v1763_v53 = vrot.slane %v1193_v50, %v1197_v48  ;;  %v1765_v54 = vrot.slane %v1193_v50, %v1205_v49  ;;  %v1767_v55 = vrot.slane %v1193_v50, %v1201_v51  ;;  %v1769_v56 = vrot.slane %v1193_v50, %v1209_v52  ;;  %s1480_s13 = sshll.u32 %s1686_s2, 4  ;;  %s1481_s13 = int_to_ptr.vmem [resolvable:$true] %s1480_s13 }
  0x39   :  { %s1651_s14 = scalar_lea.vmem %s1481_s13, 6656  ;;  %p1656_p3 = scmp.lt.s32.totalorder %s1481_s13, %s1481_s13 }
  0x3a   :  { %561 = vmatpush1.bf16.msra.mxu0 %v1574_v19  ;;  %724 = vmatpush1.bf16.msra.mxu1 %v1575_v20  ;;  %p1652_p2 = scmp.ne.s32.totalorder %s1481_s13, %s1651_s14  ;;  %p1657_p4 = scmp.lt.s32.totalorder %s1651_s14, %s1651_s14 }
  0x3b   :  { %562 = vmatprep.subr.bf16.mxu0 %v1576_v21  ;;  %725 = vmatprep.subr.bf16.mxu1 %v1578_v22 }
  0x3c   :  { %p1658_p5 = por %p1657_p4, %p1656_p3 }
  0x3e   :  { %563 = vmatpush1.bf16.msra.mxu0 %v1580_v23  ;;  %726 = vmatpush1.bf16.msra.mxu1 %v1581_v24  ;;  %p1659_p6 = pnand %p1658_p5, %p1652_p2 }
  0x3f   :  { %564 = vmatprep.subr.bf16.mxu0 %v1582_v25  ;;  %727 = vmatprep.subr.bf16.mxu1 %v1584_v26 }
  0x42   :  { %565 = vmatpush1.bf16.msra.mxu0 %v1586_v27  ;;  %728 = vmatpush1.bf16.msra.mxu1 %v1587_v28 }
  0x43   :  { %566 = vmatprep.subr.bf16.mxu0 %v1588_v29  ;;  %729 = vmatprep.subr.bf16.mxu1 %v1590_v30 }
  0x46   :  { %567 = vmatpush1.bf16.msra.mxu0 %v1592_v31  ;;  %730 = vmatpush1.bf16.msra.mxu1 %v1593_v32 }
  0x49   :  { %585 = vmatmul.mubr.bf16.vlgmr.msra.gmra.mrb[0].mxu0 %v1594_v33  ;;  %748 = vmatmul.mubr.bf16.vlgmr.msra.gmra.mrb[0].mxu1 %v1594_v33 }
  0x4a   :  { %594 = vmatprep.mubr.bf16.mxu0 %v1685_v0  ;;  %757 = vmatprep.mubr.bf16.mxu1 %v1685_v0 }
  0x51   :  { %595 = vmatmul.mubr.bf16.gmra.mrb[4].mxu0 %v1595_v34  ;;  %758 = vmatmul.mubr.bf16.gmra.mrb[4].mxu1 %v1595_v34 }
  0x52   :  { %604 = vmatprep.mubr.bf16.mxu0 %v1685_v0  ;;  %767 = vmatprep.mubr.bf16.mxu1 %v1685_v0 }
  0x59   :  { %605 = vmatmul.mubr.bf16.gmra.mrb[8].mxu0 %v1596_v35  ;;  %768 = vmatmul.mubr.bf16.gmra.mrb[8].mxu1 %v1596_v35 }
  0x5a   :  { %614 = vmatprep.mubr.bf16.mxu0 %v1685_v0  ;;  %777 = vmatprep.mubr.bf16.mxu1 %v1685_v0 }
  0x61   :  { %615 = vmatmul.mubr.bf16.gmra.mrb[12].mxu0 %v1597_v36  ;;  %778 = vmatmul.mubr.bf16.gmra.mrb[12].mxu1 %v1597_v36 }
  0x62   :  { %624 = vmatprep.mubr.bf16.mxu0 %v1685_v0  ;;  %787 = vmatprep.mubr.bf16.mxu1 %v1685_v0 }
  0x69   :  { %625 = vmatmul.mubr.bf16.gmra.mrb[16].mxu0 %v1598_v37  ;;  %788 = vmatmul.mubr.bf16.gmra.mrb[16].mxu1 %v1598_v37 }
  0x6a   :  { %634 = vmatprep.mubr.bf16.mxu0 %v1685_v0  ;;  %797 = vmatprep.mubr.bf16.mxu1 %v1685_v0 }
  0x71   :  { %635 = vmatmul.mubr.bf16.gmra.mrb[20].mxu0 %v1599_v38  ;;  %798 = vmatmul.mubr.bf16.gmra.mrb[20].mxu1 %v1599_v38 }
  0x72   :  { %644 = vmatprep.mubr.bf16.mxu0 %v1685_v0  ;;  %807 = vmatprep.mubr.bf16.mxu1 %v1685_v0 }
  0x79   :  { %645 = vmatmul.mubr.bf16.gmra.mrb[24].mxu0 %v1600_v39  ;;  %808 = vmatmul.mubr.bf16.gmra.mrb[24].mxu1 %v1600_v39 }
  0x7a   :  { %654 = vmatprep.mubr.bf16.mxu0 %v1685_v0  ;;  %817 = vmatprep.mubr.bf16.mxu1 %v1685_v0 }
  0x81   :  { %655 = vmatmul.mubr.bf16.gmra.mrb[28].mxu0 %v1601_v40  ;;  %818 = vmatmul.mubr.bf16.gmra.mrb[28].mxu1 %v1601_v40 }
  0x82   :  { %664 = vmatprep.mubr.bf16.mxu0 %v1685_v0  ;;  %827 = vmatprep.mubr.bf16.mxu1 %v1685_v0 }
  0x89   :  { %665 = vmatmul.mubr.bf16.gmra.mrb[32].mxu0 %v1602_v41  ;;  %828 = vmatmul.mubr.bf16.gmra.mrb[32].mxu1 %v1602_v41 }
  0x8a   :  { %674 = vmatprep.mubr.bf16.mxu0 %v1685_v0  ;;  %837 = vmatprep.mubr.bf16.mxu1 %v1685_v0 }
  0x91   :  { %675 = vmatmul.mubr.bf16.gmra.mrb[36].mxu0 %v1603_v42  ;;  %838 = vmatmul.mubr.bf16.gmra.mrb[36].mxu1 %v1603_v42 }
  0x92   :  { %684 = vmatprep.mubr.bf16.mxu0 %v1685_v0  ;;  %847 = vmatprep.mubr.bf16.mxu1 %v1685_v0 }
  0x99   :  { %685 = vmatmul.mubr.bf16.gmra.mrb[40].mxu0 %v1604_v43  ;;  %848 = vmatmul.mubr.bf16.gmra.mrb[40].mxu1 %v1604_v43 }
  0x9a   :  { %694 = vmatprep.mubr.bf16.mxu0 %v1685_v0  ;;  %857 = vmatprep.mubr.bf16.mxu1 %v1685_v0 }
  0xa1   :  { %695 = vmatmul.mubr.bf16.gmra.mrb[44].mxu0 %v1605_v44  ;;  %858 = vmatmul.mubr.bf16.gmra.mrb[44].mxu1 %v1605_v44 }
  0xa2   :  { %704 = vmatprep.mubr.bf16.mxu0 %v1685_v0  ;;  %867 = vmatprep.mubr.bf16.mxu1 %v1685_v0 }
  0xa9   :  { %705 = vmatmul.mubr.bf16.gmra.mrb[48].mxu0 %v1606_v45  ;;  %868 = vmatmul.mubr.bf16.gmra.mrb[48].mxu1 %v1606_v45 }
 0x11c   :  { %v586_v57 = vpop.f32.mrb[0].mxu0  ;;  %v749_v58 = vpop.f32.mrb[0].mxu1 }
 0x11d   :  { %v1215_v59 = vadd.f32 %v1763_v53, %v586_v57  ;;  %v1217_v60 = vadd.f32 %v1765_v54, %v749_v58  ;;  %v588_v61 = vpop.f32.mrb[1].mxu0  ;;  %v751_v62 = vpop.f32.mrb[1].mxu1 }
 0x11e   :  { %v1216_v63 = vadd.f32 %v1767_v55, %v588_v61  ;;  %v1218_v0 = vadd.f32 %v1769_v56, %v751_v62  ;;  %v590_v1 = vpop.f32.mrb[2].mxu0  ;;  %v753_v2 = vpop.f32.mrb[2].mxu1 }
 0x11f   :  { %v1319_v3 = vmax.f32 %v1215_v59, 0.0  ;;  %v1219_v4 = vadd.f32 %v1763_v53, %v590_v1  ;;  %v592_v5 = vpop.f32.mrb[3].mxu0  ;;  %v755_v6 = vpop.f32.mrb[3].mxu1  ;;  %v1221_v11 = vadd.f32 %v1765_v54, %v753_v2 }
 0x120   :  { %v1320_v7 = vmax.f32 %v1216_v63, 0.0  ;;  %v1220_v8 = vadd.f32 %v1767_v55, %v592_v5  ;;  %v1222_v14 = vadd.f32 %v1769_v56, %v755_v6 }
 0x121   :  { %v1371_v9 = vadd.f32 %v1319_v3, %v1217_v60  ;;  %v1321_v10 = vmax.f32 %v1219_v4, 0.0 }
 0x122   :  { %v1372_v12 = vadd.f32 %v1320_v7, %v1218_v0  ;;  %v1322_v13 = vmax.f32 %v1220_v8, 0.0 }
 0x123   :  { %1423 = vst [vmem:[#allocation8] sm:$0xff] %v1371_v9  ;;  %v1373_v15 = vadd.f32 %v1321_v10, %v1221_v11 }
 0x124   :  { %1424 = vst [vmem:[#allocation8 + $0x8] sm:$0xff] %v1372_v12  ;;  %v1374_v16 = vadd.f32 %v1322_v13, %v1222_v14  ;;  %v596_v17 = vpop.f32.mrb[4].mxu0  ;;  %v759_v18 = vpop.f32.mrb[4].mxu1 }
 0x125   :  { %1425 = vst [vmem:[#allocation8 + $0x10] sm:$0xff] %v1373_v15  ;;  %v1223_v19 = vadd.f32 %v1763_v53, %v596_v17  ;;  %v1225_v20 = vadd.f32 %v1765_v54, %v759_v18  ;;  %v598_v21 = vpop.f32.mrb[5].mxu0  ;;  %v761_v22 = vpop.f32.mrb[5].mxu1 }
 0x126   :  { %1426 = vst [vmem:[#allocation8 + $0x18] sm:$0xff] %v1374_v16  ;;  %v1224_v23 = vadd.f32 %v1767_v55, %v598_v21  ;;  %v1226_v24 = vadd.f32 %v1769_v56, %v761_v22  ;;  %v600_v25 = vpop.f32.mrb[6].mxu0  ;;  %v763_v26 = vpop.f32.mrb[6].mxu1 }
 0x127   :  { %v1323_v27 = vmax.f32 %v1223_v19, 0.0  ;;  %v1227_v28 = vadd.f32 %v1763_v53, %v600_v25  ;;  %v602_v29 = vpop.f32.mrb[7].mxu0  ;;  %v765_v30 = vpop.f32.mrb[7].mxu1  ;;  %v1229_v35 = vadd.f32 %v1765_v54, %v763_v26 }
 0x128   :  { %v1324_v31 = vmax.f32 %v1224_v23, 0.0  ;;  %v1228_v32 = vadd.f32 %v1767_v55, %v602_v29  ;;  %v1230_v38 = vadd.f32 %v1769_v56, %v765_v30 }
 0x129   :  { %v1375_v33 = vadd.f32 %v1323_v27, %v1225_v20  ;;  %v1325_v34 = vmax.f32 %v1227_v28, 0.0 }
 0x12a   :  { %v1376_v36 = vadd.f32 %v1324_v31, %v1226_v24  ;;  %v1326_v37 = vmax.f32 %v1228_v32, 0.0 }
 0x12b   :  { %1427 = vst [vmem:[#allocation8 + $0x20] sm:$0xff] %v1375_v33  ;;  %v1377_v39 = vadd.f32 %v1325_v34, %v1229_v35 }
 0x12c   :  { %1428 = vst [vmem:[#allocation8 + $0x28] sm:$0xff] %v1376_v36  ;;  %v1378_v40 = vadd.f32 %v1326_v37, %v1230_v38  ;;  %v606_v41 = vpop.f32.mrb[8].mxu0  ;;  %v769_v42 = vpop.f32.mrb[8].mxu1 }
 0x12d   :  { %1429 = vst [vmem:[#allocation8 + $0x30] sm:$0xff] %v1377_v39  ;;  %v1231_v43 = vadd.f32 %v1763_v53, %v606_v41  ;;  %v1233_v44 = vadd.f32 %v1765_v54, %v769_v42  ;;  %v608_v45 = vpop.f32.mrb[9].mxu0  ;;  %v771_v46 = vpop.f32.mrb[9].mxu1 }
 0x12e   :  { %1430 = vst [vmem:[#allocation8 + $0x38] sm:$0xff] %v1378_v40  ;;  %v1232_v47 = vadd.f32 %v1767_v55, %v608_v45  ;;  %v1234_v48 = vadd.f32 %v1769_v56, %v771_v46  ;;  %v610_v49 = vpop.f32.mrb[10].mxu0  ;;  %v773_v50 = vpop.f32.mrb[10].mxu1 }
 0x12f   :  { %v1327_v51 = vmax.f32 %v1231_v43, 0.0  ;;  %v1235_v52 = vadd.f32 %v1763_v53, %v610_v49  ;;  %v612_v57 = vpop.f32.mrb[11].mxu0  ;;  %v775_v58 = vpop.f32.mrb[11].mxu1  ;;  %v1237_v63 = vadd.f32 %v1765_v54, %v773_v50 }
 0x130   :  { %v1328_v59 = vmax.f32 %v1232_v47, 0.0  ;;  %v1236_v60 = vadd.f32 %v1767_v55, %v612_v57  ;;  %v1238_v2 = vadd.f32 %v1769_v56, %v775_v58 }
 0x131   :  { %v1379_v61 = vadd.f32 %v1327_v51, %v1233_v44  ;;  %v1329_v62 = vmax.f32 %v1235_v52, 0.0 }
 0x132   :  { %v1380_v0 = vadd.f32 %v1328_v59, %v1234_v48  ;;  %v1330_v1 = vmax.f32 %v1236_v60, 0.0 }
 0x133   :  { %1431 = vst [vmem:[#allocation8 + $0x40] sm:$0xff] %v1379_v61  ;;  %v1381_v3 = vadd.f32 %v1329_v62, %v1237_v63 }
 0x134   :  { %1432 = vst [vmem:[#allocation8 + $0x48] sm:$0xff] %v1380_v0  ;;  %v1382_v4 = vadd.f32 %v1330_v1, %v1238_v2  ;;  %v616_v5 = vpop.f32.mrb[12].mxu0  ;;  %v779_v6 = vpop.f32.mrb[12].mxu1 }
 0x135   :  { %1433 = vst [vmem:[#allocation8 + $0x50] sm:$0xff] %v1381_v3  ;;  %v1239_v7 = vadd.f32 %v1763_v53, %v616_v5  ;;  %v1241_v8 = vadd.f32 %v1765_v54, %v779_v6  ;;  %v618_v9 = vpop.f32.mrb[13].mxu0  ;;  %v781_v10 = vpop.f32.mrb[13].mxu1 }
 0x136   :  { %1434 = vst [vmem:[#allocation8 + $0x58] sm:$0xff] %v1382_v4  ;;  %v1240_v11 = vadd.f32 %v1767_v55, %v618_v9  ;;  %v1242_v12 = vadd.f32 %v1769_v56, %v781_v10  ;;  %v620_v13 = vpop.f32.mrb[14].mxu0  ;;  %v783_v14 = vpop.f32.mrb[14].mxu1 }
 0x137   :  { %v1331_v15 = vmax.f32 %v1239_v7, 0.0  ;;  %v1243_v16 = vadd.f32 %v1763_v53, %v620_v13  ;;  %v622_v17 = vpop.f32.mrb[15].mxu0  ;;  %v785_v18 = vpop.f32.mrb[15].mxu1  ;;  %v1245_v23 = vadd.f32 %v1765_v54, %v783_v14 }
 0x138   :  { %v1332_v19 = vmax.f32 %v1240_v11, 0.0  ;;  %v1244_v20 = vadd.f32 %v1767_v55, %v622_v17  ;;  %v1246_v26 = vadd.f32 %v1769_v56, %v785_v18 }
 0x139   :  { %v1383_v21 = vadd.f32 %v1331_v15, %v1241_v8  ;;  %v1333_v22 = vmax.f32 %v1243_v16, 0.0 }
 0x13a   :  { %v1384_v24 = vadd.f32 %v1332_v19, %v1242_v12  ;;  %v1334_v25 = vmax.f32 %v1244_v20, 0.0 }
 0x13b   :  { %1435 = vst [vmem:[#allocation8 + $0x60] sm:$0xff] %v1383_v21  ;;  %v1385_v27 = vadd.f32 %v1333_v22, %v1245_v23 }
 0x13c   :  { %1436 = vst [vmem:[#allocation8 + $0x68] sm:$0xff] %v1384_v24  ;;  %v1386_v28 = vadd.f32 %v1334_v25, %v1246_v26  ;;  %v626_v29 = vpop.f32.mrb[16].mxu0  ;;  %v789_v30 = vpop.f32.mrb[16].mxu1 }
 0x13d   :  { %1437 = vst [vmem:[#allocation8 + $0x70] sm:$0xff] %v1385_v27  ;;  %v1247_v31 = vadd.f32 %v1763_v53, %v626_v29  ;;  %v1249_v32 = vadd.f32 %v1765_v54, %v789_v30  ;;  %v628_v33 = vpop.f32.mrb[17].mxu0  ;;  %v791_v34 = vpop.f32.mrb[17].mxu1 }
 0x13e   :  { %1438 = vst [vmem:[#allocation8 + $0x78] sm:$0xff] %v1386_v28  ;;  %v1248_v35 = vadd.f32 %v1767_v55, %v628_v33  ;;  %v1250_v36 = vadd.f32 %v1769_v56, %v791_v34  ;;  %v630_v37 = vpop.f32.mrb[18].mxu0  ;;  %v793_v38 = vpop.f32.mrb[18].mxu1 }
 0x13f   :  { %v1335_v39 = vmax.f32 %v1247_v31, 0.0  ;;  %v1251_v40 = vadd.f32 %v1763_v53, %v630_v37  ;;  %v632_v41 = vpop.f32.mrb[19].mxu0  ;;  %v795_v42 = vpop.f32.mrb[19].mxu1  ;;  %v1253_v47 = vadd.f32 %v1765_v54, %v793_v38 }
 0x140   :  { %v1336_v43 = vmax.f32 %v1248_v35, 0.0  ;;  %v1252_v44 = vadd.f32 %v1767_v55, %v632_v41  ;;  %v1254_v50 = vadd.f32 %v1769_v56, %v795_v42 }
 0x141   :  { %v1387_v45 = vadd.f32 %v1335_v39, %v1249_v32  ;;  %v1337_v46 = vmax.f32 %v1251_v40, 0.0 }
 0x142   :  { %v1388_v48 = vadd.f32 %v1336_v43, %v1250_v36  ;;  %v1338_v49 = vmax.f32 %v1252_v44, 0.0 }
 0x143   :  { %1439 = vst [vmem:[#allocation8 + $0x80] sm:$0xff] %v1387_v45  ;;  %v1389_v51 = vadd.f32 %v1337_v46, %v1253_v47 }
 0x144   :  { %1440 = vst [vmem:[#allocation8 + $0x88] sm:$0xff] %v1388_v48  ;;  %v1390_v52 = vadd.f32 %v1338_v49, %v1254_v50  ;;  %v636_v57 = vpop.f32.mrb[20].mxu0  ;;  %v799_v58 = vpop.f32.mrb[20].mxu1 }
 0x145   :  { %1441 = vst [vmem:[#allocation8 + $0x90] sm:$0xff] %v1389_v51  ;;  %v1255_v59 = vadd.f32 %v1763_v53, %v636_v57  ;;  %v1257_v60 = vadd.f32 %v1765_v54, %v799_v58  ;;  %v638_v61 = vpop.f32.mrb[21].mxu0  ;;  %v801_v62 = vpop.f32.mrb[21].mxu1 }
 0x146   :  { %1442 = vst [vmem:[#allocation8 + $0x98] sm:$0xff] %v1390_v52  ;;  %v1256_v63 = vadd.f32 %v1767_v55, %v638_v61  ;;  %v1258_v0 = vadd.f32 %v1769_v56, %v801_v62  ;;  %v640_v1 = vpop.f32.mrb[22].mxu0  ;;  %v803_v2 = vpop.f32.mrb[22].mxu1 }
 0x147   :  { %v1339_v3 = vmax.f32 %v1255_v59, 0.0  ;;  %v1259_v4 = vadd.f32 %v1763_v53, %v640_v1  ;;  %v642_v5 = vpop.f32.mrb[23].mxu0  ;;  %v805_v6 = vpop.f32.mrb[23].mxu1  ;;  %v1261_v11 = vadd.f32 %v1765_v54, %v803_v2 }
 0x148   :  { %v1340_v7 = vmax.f32 %v1256_v63, 0.0  ;;  %v1260_v8 = vadd.f32 %v1767_v55, %v642_v5  ;;  %v1262_v14 = vadd.f32 %v1769_v56, %v805_v6 }
 0x149   :  { %v1391_v9 = vadd.f32 %v1339_v3, %v1257_v60  ;;  %v1341_v10 = vmax.f32 %v1259_v4, 0.0 }
 0x14a   :  { %v1392_v12 = vadd.f32 %v1340_v7, %v1258_v0  ;;  %v1342_v13 = vmax.f32 %v1260_v8, 0.0 }
 0x14b   :  { %1443 = vst [vmem:[#allocation8 + $0xa0] sm:$0xff] %v1391_v9  ;;  %v1393_v15 = vadd.f32 %v1341_v10, %v1261_v11 }
 0x14c   :  { %1444 = vst [vmem:[#allocation8 + $0xa8] sm:$0xff] %v1392_v12  ;;  %v1394_v16 = vadd.f32 %v1342_v13, %v1262_v14  ;;  %v646_v17 = vpop.f32.mrb[24].mxu0  ;;  %v809_v18 = vpop.f32.mrb[24].mxu1 }
 0x14d   :  { %1445 = vst [vmem:[#allocation8 + $0xb0] sm:$0xff] %v1393_v15  ;;  %v1263_v19 = vadd.f32 %v1763_v53, %v646_v17  ;;  %v1265_v20 = vadd.f32 %v1765_v54, %v809_v18  ;;  %v648_v21 = vpop.f32.mrb[25].mxu0  ;;  %v811_v22 = vpop.f32.mrb[25].mxu1 }
 0x14e   :  { %1446 = vst [vmem:[#allocation8 + $0xb8] sm:$0xff] %v1394_v16  ;;  %v1264_v23 = vadd.f32 %v1767_v55, %v648_v21  ;;  %v1266_v24 = vadd.f32 %v1769_v56, %v811_v22  ;;  %v650_v25 = vpop.f32.mrb[26].mxu0  ;;  %v813_v26 = vpop.f32.mrb[26].mxu1 }
 0x14f   :  { %v1343_v27 = vmax.f32 %v1263_v19, 0.0  ;;  %v1267_v28 = vadd.f32 %v1763_v53, %v650_v25  ;;  %v652_v29 = vpop.f32.mrb[27].mxu0  ;;  %v815_v30 = vpop.f32.mrb[27].mxu1  ;;  %v1269_v35 = vadd.f32 %v1765_v54, %v813_v26 }
 0x150   :  { %v1344_v31 = vmax.f32 %v1264_v23, 0.0  ;;  %v1268_v32 = vadd.f32 %v1767_v55, %v652_v29  ;;  %v1270_v38 = vadd.f32 %v1769_v56, %v815_v30 }
 0x151   :  { %v1395_v33 = vadd.f32 %v1343_v27, %v1265_v20  ;;  %v1345_v34 = vmax.f32 %v1267_v28, 0.0 }
 0x152   :  { %v1396_v36 = vadd.f32 %v1344_v31, %v1266_v24  ;;  %v1346_v37 = vmax.f32 %v1268_v32, 0.0 }
 0x153   :  { %1447 = vst [vmem:[#allocation8 + $0xc0] sm:$0xff] %v1395_v33  ;;  %v1397_v39 = vadd.f32 %v1345_v34, %v1269_v35 }
 0x154   :  { %1448 = vst [vmem:[#allocation8 + $0xc8] sm:$0xff] %v1396_v36  ;;  %v1398_v40 = vadd.f32 %v1346_v37, %v1270_v38  ;;  %v656_v41 = vpop.f32.mrb[28].mxu0  ;;  %v819_v42 = vpop.f32.mrb[28].mxu1 }
 0x155   :  { %1449 = vst [vmem:[#allocation8 + $0xd0] sm:$0xff] %v1397_v39  ;;  %v1271_v43 = vadd.f32 %v1763_v53, %v656_v41  ;;  %v1273_v44 = vadd.f32 %v1765_v54, %v819_v42  ;;  %v658_v45 = vpop.f32.mrb[29].mxu0  ;;  %v821_v46 = vpop.f32.mrb[29].mxu1 }
 0x156   :  { %1450 = vst [vmem:[#allocation8 + $0xd8] sm:$0xff] %v1398_v40  ;;  %v1272_v47 = vadd.f32 %v1767_v55, %v658_v45  ;;  %v1274_v48 = vadd.f32 %v1769_v56, %v821_v46  ;;  %v660_v49 = vpop.f32.mrb[30].mxu0  ;;  %v823_v50 = vpop.f32.mrb[30].mxu1 }
 0x157   :  { %v1347_v51 = vmax.f32 %v1271_v43, 0.0  ;;  %v1275_v52 = vadd.f32 %v1763_v53, %v660_v49  ;;  %v662_v57 = vpop.f32.mrb[31].mxu0  ;;  %v825_v58 = vpop.f32.mrb[31].mxu1  ;;  %v1277_v63 = vadd.f32 %v1765_v54, %v823_v50 }
 0x158   :  { %v1348_v59 = vmax.f32 %v1272_v47, 0.0  ;;  %v1276_v60 = vadd.f32 %v1767_v55, %v662_v57  ;;  %v1278_v2 = vadd.f32 %v1769_v56, %v825_v58 }
 0x159   :  { %v1399_v61 = vadd.f32 %v1347_v51, %v1273_v44  ;;  %v1349_v62 = vmax.f32 %v1275_v52, 0.0 }
 0x15a   :  { %v1400_v0 = vadd.f32 %v1348_v59, %v1274_v48  ;;  %v1350_v1 = vmax.f32 %v1276_v60, 0.0 }
 0x15b   :  { %1451 = vst [vmem:[#allocation8 + $0xe0] sm:$0xff] %v1399_v61  ;;  %v1401_v3 = vadd.f32 %v1349_v62, %v1277_v63 }
 0x15c   :  { %1452 = vst [vmem:[#allocation8 + $0xe8] sm:$0xff] %v1400_v0  ;;  %v1402_v4 = vadd.f32 %v1350_v1, %v1278_v2  ;;  %v666_v5 = vpop.f32.mrb[32].mxu0  ;;  %v829_v6 = vpop.f32.mrb[32].mxu1 }
 0x15d   :  { %1453 = vst [vmem:[#allocation8 + $0xf0] sm:$0xff] %v1401_v3  ;;  %v1279_v7 = vadd.f32 %v1763_v53, %v666_v5  ;;  %v1281_v8 = vadd.f32 %v1765_v54, %v829_v6  ;;  %v668_v9 = vpop.f32.mrb[33].mxu0  ;;  %v831_v10 = vpop.f32.mrb[33].mxu1 }
 0x15e   :  { %1454 = vst [vmem:[#allocation8 + $0xf8] sm:$0xff] %v1402_v4  ;;  %v1280_v11 = vadd.f32 %v1767_v55, %v668_v9  ;;  %v1282_v12 = vadd.f32 %v1769_v56, %v831_v10  ;;  %v670_v13 = vpop.f32.mrb[34].mxu0  ;;  %v833_v14 = vpop.f32.mrb[34].mxu1 }
 0x15f   :  { %v1351_v15 = vmax.f32 %v1279_v7, 0.0  ;;  %v1283_v16 = vadd.f32 %v1763_v53, %v670_v13  ;;  %v672_v17 = vpop.f32.mrb[35].mxu0  ;;  %v835_v18 = vpop.f32.mrb[35].mxu1  ;;  %v1285_v23 = vadd.f32 %v1765_v54, %v833_v14 }
 0x160   :  { %v1352_v19 = vmax.f32 %v1280_v11, 0.0  ;;  %v1284_v20 = vadd.f32 %v1767_v55, %v672_v17  ;;  %v1286_v26 = vadd.f32 %v1769_v56, %v835_v18 }
 0x161   :  { %v1403_v21 = vadd.f32 %v1351_v15, %v1281_v8  ;;  %v1353_v22 = vmax.f32 %v1283_v16, 0.0 }
 0x162   :  { %v1404_v24 = vadd.f32 %v1352_v19, %v1282_v12  ;;  %v1354_v25 = vmax.f32 %v1284_v20, 0.0 }
 0x163   :  { %1455 = vst [vmem:[#allocation8 + $0x100] sm:$0xff] %v1403_v21  ;;  %v1405_v27 = vadd.f32 %v1353_v22, %v1285_v23 }
 0x164   :  { %1456 = vst [vmem:[#allocation8 + $0x108] sm:$0xff] %v1404_v24  ;;  %v1406_v28 = vadd.f32 %v1354_v25, %v1286_v26  ;;  %v676_v29 = vpop.f32.mrb[36].mxu0  ;;  %v839_v30 = vpop.f32.mrb[36].mxu1 }
 0x165   :  { %1457 = vst [vmem:[#allocation8 + $0x110] sm:$0xff] %v1405_v27  ;;  %v1287_v31 = vadd.f32 %v1763_v53, %v676_v29  ;;  %v1289_v32 = vadd.f32 %v1765_v54, %v839_v30  ;;  %v678_v33 = vpop.f32.mrb[37].mxu0  ;;  %v841_v34 = vpop.f32.mrb[37].mxu1 }
 0x166   :  { %1458 = vst [vmem:[#allocation8 + $0x118] sm:$0xff] %v1406_v28  ;;  %v1288_v35 = vadd.f32 %v1767_v55, %v678_v33  ;;  %v1290_v36 = vadd.f32 %v1769_v56, %v841_v34  ;;  %v680_v37 = vpop.f32.mrb[38].mxu0  ;;  %v843_v38 = vpop.f32.mrb[38].mxu1 }
 0x167   :  { %v1355_v39 = vmax.f32 %v1287_v31, 0.0  ;;  %v1291_v40 = vadd.f32 %v1763_v53, %v680_v37  ;;  %v682_v41 = vpop.f32.mrb[39].mxu0  ;;  %v845_v42 = vpop.f32.mrb[39].mxu1  ;;  %v1293_v47 = vadd.f32 %v1765_v54, %v843_v38 }
 0x168   :  { %v1356_v43 = vmax.f32 %v1288_v35, 0.0  ;;  %v1292_v44 = vadd.f32 %v1767_v55, %v682_v41  ;;  %v1294_v50 = vadd.f32 %v1769_v56, %v845_v42 }
 0x169   :  { %v1407_v45 = vadd.f32 %v1355_v39, %v1289_v32  ;;  %v1357_v46 = vmax.f32 %v1291_v40, 0.0 }
 0x16a   :  { %v1408_v48 = vadd.f32 %v1356_v43, %v1290_v36  ;;  %v1358_v49 = vmax.f32 %v1292_v44, 0.0 }
 0x16b   :  { %1459 = vst [vmem:[#allocation8 + $0x120] sm:$0xff] %v1407_v45  ;;  %v1409_v51 = vadd.f32 %v1357_v46, %v1293_v47 }
 0x16c   :  { %1460 = vst [vmem:[#allocation8 + $0x128] sm:$0xff] %v1408_v48  ;;  %v1410_v52 = vadd.f32 %v1358_v49, %v1294_v50  ;;  %v686_v57 = vpop.f32.mrb[40].mxu0  ;;  %v849_v58 = vpop.f32.mrb[40].mxu1 }
 0x16d   :  { %1461 = vst [vmem:[#allocation8 + $0x130] sm:$0xff] %v1409_v51  ;;  %v1295_v59 = vadd.f32 %v1763_v53, %v686_v57  ;;  %v1297_v60 = vadd.f32 %v1765_v54, %v849_v58  ;;  %v688_v61 = vpop.f32.mrb[41].mxu0  ;;  %v851_v62 = vpop.f32.mrb[41].mxu1 }
 0x16e   :  { %1462 = vst [vmem:[#allocation8 + $0x138] sm:$0xff] %v1410_v52  ;;  %v1296_v63 = vadd.f32 %v1767_v55, %v688_v61  ;;  %v1298_v0 = vadd.f32 %v1769_v56, %v851_v62  ;;  %v690_v1 = vpop.f32.mrb[42].mxu0  ;;  %v853_v2 = vpop.f32.mrb[42].mxu1 }
 0x16f   :  { %v1359_v3 = vmax.f32 %v1295_v59, 0.0  ;;  %v1299_v4 = vadd.f32 %v1763_v53, %v690_v1  ;;  %v692_v5 = vpop.f32.mrb[43].mxu0  ;;  %v855_v6 = vpop.f32.mrb[43].mxu1  ;;  %v1301_v11 = vadd.f32 %v1765_v54, %v853_v2 }
 0x170   :  { %v1360_v7 = vmax.f32 %v1296_v63, 0.0  ;;  %v1300_v8 = vadd.f32 %v1767_v55, %v692_v5  ;;  %v1302_v14 = vadd.f32 %v1769_v56, %v855_v6 }
 0x171   :  { %v1411_v9 = vadd.f32 %v1359_v3, %v1297_v60  ;;  %v1361_v10 = vmax.f32 %v1299_v4, 0.0 }
 0x172   :  { %v1412_v12 = vadd.f32 %v1360_v7, %v1298_v0  ;;  %v1362_v13 = vmax.f32 %v1300_v8, 0.0 }
 0x173   :  { %1463 = vst [vmem:[#allocation8 + $0x140] sm:$0xff] %v1411_v9  ;;  %v1413_v15 = vadd.f32 %v1361_v10, %v1301_v11 }
 0x174   :  { %1464 = vst [vmem:[#allocation8 + $0x148] sm:$0xff] %v1412_v12  ;;  %v1414_v16 = vadd.f32 %v1362_v13, %v1302_v14  ;;  %v696_v17 = vpop.f32.mrb[44].mxu0  ;;  %v859_v18 = vpop.f32.mrb[44].mxu1 }
 0x175   :  { %1465 = vst [vmem:[#allocation8 + $0x150] sm:$0xff] %v1413_v15  ;;  %v1303_v19 = vadd.f32 %v1763_v53, %v696_v17  ;;  %v1305_v20 = vadd.f32 %v1765_v54, %v859_v18  ;;  %v698_v21 = vpop.f32.mrb[45].mxu0  ;;  %v861_v22 = vpop.f32.mrb[45].mxu1 }
 0x176   :  { %1466 = vst [vmem:[#allocation8 + $0x158] sm:$0xff] %v1414_v16  ;;  %v1304_v23 = vadd.f32 %v1767_v55, %v698_v21  ;;  %v1306_v24 = vadd.f32 %v1769_v56, %v861_v22  ;;  %v700_v25 = vpop.f32.mrb[46].mxu0  ;;  %v863_v26 = vpop.f32.mrb[46].mxu1 }
 0x177   :  { %v1363_v27 = vmax.f32 %v1303_v19, 0.0  ;;  %v1307_v28 = vadd.f32 %v1763_v53, %v700_v25  ;;  %v702_v29 = vpop.f32.mrb[47].mxu0  ;;  %v865_v30 = vpop.f32.mrb[47].mxu1  ;;  %v1309_v35 = vadd.f32 %v1765_v54, %v863_v26 }
 0x178   :  { %v1364_v31 = vmax.f32 %v1304_v23, 0.0  ;;  %v1308_v32 = vadd.f32 %v1767_v55, %v702_v29  ;;  %v1310_v38 = vadd.f32 %v1769_v56, %v865_v30 }
 0x179   :  { %v1415_v33 = vadd.f32 %v1363_v27, %v1305_v20  ;;  %v1365_v34 = vmax.f32 %v1307_v28, 0.0 }
 0x17a   :  { %v1416_v36 = vadd.f32 %v1364_v31, %v1306_v24  ;;  %v1366_v37 = vmax.f32 %v1308_v32, 0.0 }
 0x17b   :  { %1467 = vst [vmem:[#allocation8 + $0x160] sm:$0xff] %v1415_v33  ;;  %v1417_v39 = vadd.f32 %v1365_v34, %v1309_v35 }
 0x17c   :  { %1468 = vst [vmem:[#allocation8 + $0x168] sm:$0xff] %v1416_v36  ;;  %v1418_v40 = vadd.f32 %v1366_v37, %v1310_v38  ;;  %v706_v41 = vpop.f32.mrb[48].mxu0  ;;  %v869_v42 = vpop.f32.mrb[48].mxu1 }
 0x17d   :  { %1469 = vst [vmem:[#allocation8 + $0x170] sm:$0xff] %v1417_v39  ;;  %v1311_v43 = vadd.f32 %v1763_v53, %v706_v41  ;;  %v1313_v44 = vadd.f32 %v1765_v54, %v869_v42  ;;  %v708_v45 = vpop.f32.mrb[49].mxu0  ;;  %v871_v46 = vpop.f32.mrb[49].mxu1 }
 0x17e   :  { %1470 = vst [vmem:[#allocation8 + $0x178] sm:$0xff] %v1418_v40  ;;  %v1312_v47 = vadd.f32 %v1767_v55, %v708_v45  ;;  %v1314_v48 = vadd.f32 %v1769_v56, %v871_v46  ;;  %v710_v49 = vpop.f32.mrb[50].mxu0  ;;  %v873_v50 = vpop.f32.mrb[50].mxu1 }
 0x17f   :  { %v1367_v51 = vmax.f32 %v1311_v43, 0.0  ;;  %v1315_v52 = vadd.f32 %v1763_v53, %v710_v49  ;;  %v712_v57 = vpop.f32.mrb[51].mxu0  ;;  %v875_v58 = vpop.f32.mrb[51].mxu1  ;;  %v1317_v63 = vadd.f32 %v1765_v54, %v873_v50 }
 0x180   :  { %v1368_v59 = vmax.f32 %v1312_v47, 0.0  ;;  %v1316_v60 = vadd.f32 %v1767_v55, %v712_v57  ;;  %v1318_v2 = vadd.f32 %v1769_v56, %v875_v58 }
 0x181   :  { %v1419_v61 = vadd.f32 %v1367_v51, %v1313_v44  ;;  %v1369_v62 = vmax.f32 %v1315_v52, 0.0 }
 0x182   :  { %v1420_v0 = vadd.f32 %v1368_v59, %v1314_v48  ;;  %v1370_v1 = vmax.f32 %v1316_v60, 0.0 }
 0x183   :  { %1471 = vst [vmem:[#allocation8 + $0x180] sm:$0xff] %v1419_v61  ;;  %v1421_v3 = vadd.f32 %v1369_v62, %v1317_v63 }
 0x184   :  { %1472 = vst [vmem:[#allocation8 + $0x188] sm:$0xff] %v1420_v0  ;;  %v1422_v4 = vadd.f32 %v1370_v1, %v1318_v2 }
 0x185   :  { %1473 = vst [vmem:[#allocation8 + $0x190] sm:$0xff] %v1421_v3 }
 0x186   :  { %1474 = vst [vmem:[#allocation8 + $0x198] sm:$0xff] %v1422_v4 }
 0x187   :  { %1662 = shalt.err (!%p1659_p6)
}
 0x188   :  { %s1663_s17 = scalar_lea.hbm %s1893_s3, 6656 }
 0x189   :  { %p1664_p7 = scmp.ne.s32.totalorder %s1893_s3, %s1663_s17  ;;  %p1667_p8 = scmp.lt.u32.totalorder %s1663_s17, %s1893_s3 }
 0x18b   :  { %p1669_p9 = pnand %p1667_p8, %p1664_p7 }
 0x18d   :  { %1672 = shalt.err (!%p1669_p9)
}
 0x18e   :  { %1486 = dma.vmem_to_hbm [thread:$0]  %s1481_s13, 6656, %s1893_s3, [#allocation5], %s1683_s0, %s1683_s0, %s1684_s9  }
 0x18f   :  { %1677 = dma.done.wait [#allocation5], 6656  }
 0x190   :  { %1678 = vsyncadd [#allocation5], 4294960640 }
 0x191   :  { %1490 = vsyncpa [#allocation4], 1 }
 0x192   :  { %1491 = vsyncpa [#allocation7], 1 }
 0x193   :  { %1492 = vsyncpa [#allocation5], 1 }

</bundles_post_ra>
